<compile_context>
chip_gen: v5e
topology: v5e:2x2
jax: 0.10.0
libtpu: 0.0.40
codegen_flags: <defaults>
</compile_context>

<pallas_src>
import jax
import jax.numpy as jnp
from jax.experimental import pallas as pl
from jax.experimental.pallas import tpu as pltpu


def _round_up(n: int, m: int) -> int:
    return ((n + m - 1) // m) * m


def _choose_batch_tile(B: int) -> int:
    """Pick a batch tile: multiple of 8, minimal padding, >=2 tiles when large."""
    B8 = _round_up(max(B, 1), 8)
    if B8 < 256:
        return B8                      # tiny batch: one small tile
    if B8 == 256:
        return 128                     # two 128-row tiles (keeps both v7x cores busy)
    best_tb, best_key = None, None
    for tb in (128, 256, 512, 1024, 2048):
        bp = _round_up(B, tb)
        n_tiles = bp // tb
        # minimize padded rows; prefer >=2 tiles (v7x megacore); then bigger tiles
        key = (bp - B, 0 if n_tiles >= 2 else 1, -tb)
        if best_key is None or key < best_key:
            best_key, best_tb = key, tb
    return best_tb


def mlp_kernel(x_ref, w1_ref, b1_ref, w2_ref, b2_ref, o_ref):
    # fc1: cast x to bf16 in-kernel (cheap VPU op, hidden under DMA/MXU);
    # accumulate in f32 on the MXU.
    x = x_ref[...].astype(jnp.bfloat16)
    h = jnp.dot(x, w1_ref[...], preferred_element_type=jnp.float32)
    # bias + ReLU in f32; padded H lanes stay exactly zero.
    h = jnp.maximum(h + b1_ref[...], 0.0)
    # fc2 against the UNPADDED (H_p, D_out) weight -> (TB, D_out) f32.
    y = jnp.dot(h.astype(jnp.bfloat16), w2_ref[...],
                preferred_element_type=jnp.float32)
    o_ref[...] = (y + b2_ref[...]).astype(o_ref.dtype)


def prepare_params(w1, b1, w2, b2):
    """One-time parameter prep (call at init, NOT per forward).

    w1: [D_in, H], b1: [H], w2: [H, D_out], b2: [D_out]  (already [in, out]).
    Returns bf16 weights with H zero-padded to a 128-lane multiple and f32
    biases shaped (1, F) for lane-wise broadcast in the kernel.
    """
    D_in, H = w1.shape
    H2, D_out = w2.shape
    assert H2 == H
    H_p = _round_up(H, 128)

    w1_p = jnp.zeros((D_in, H_p), jnp.bfloat16).at[:, :H].set(
        w1.astype(jnp.bfloat16))
    b1_p = jnp.zeros((1, H_p), jnp.float32).at[0, :H].set(b1.astype(jnp.float32))
    w2_p = jnp.zeros((H_p, D_out), jnp.bfloat16).at[:H, :].set(
        w2.astype(jnp.bfloat16))
    b2_p = b2.astype(jnp.float32).reshape(1, D_out)
    return w1_p, b1_p, w2_p, b2_p


def simple_classifier_forward(x, w1_p, b1_p, w2_p, b2_p):
    """x: [B, D_in] f32; params from prepare_params(). Returns [B, D_out] f32."""
    B, D_in = x.shape
    H_p = w1_p.shape[1]
    D_out = w2_p.shape[1]

    TB = _choose_batch_tile(B)
    B_p = _round_up(B, TB)
    n_tiles = B_p // TB

    # Only pad the batch rows when needed (padding rows are sliced off below).
    x_p = x if B_p == B else jnp.zeros((B_p, D_in), x.dtype).at[:B].set(x)

    cost = pl.CostEstimate(
        flops=2 * B_p * (D_in * H_p + H_p * D_out),
        transcendentals=0,
        bytes_accessed=(B_p * D_in * 4            # x (f32)
                        + D_in * H_p * 2          # w1 (bf16)
                        + H_p * 4                 # b1 (f32)
                        + H_p * D_out * 2         # w2 (bf16)
                        + D_out * 4               # b2 (f32)
                        + B_p * D_out * 4))       # out (f32)

    out_p = pl.pallas_call(
        mlp_kernel,
        out_shape=jax.ShapeDtypeStruct((B_p, D_out), jnp.float32),
        grid=(n_tiles,),
        in_specs=[
            # x: per-tile; last dim equals full array dim (legal, unpadded).
            pl.BlockSpec((TB, D_in), lambda i: (i, 0)),
            pl.BlockSpec((D_in, H_p), lambda i: (0, 0)),   # w1: VMEM-resident
            pl.BlockSpec((1, H_p), lambda i: (0, 0)),      # b1: VMEM-resident
            pl.BlockSpec((H_p, D_out), lambda i: (0, 0)),  # w2: VMEM-resident
            pl.BlockSpec((1, D_out), lambda i: (0, 0)),    # b2: VMEM-resident
        ],
        # Output block last dim = D_out = full array dim -> legal, lane-masked
        # store of only the real columns (no padded writeback stream).
        out_specs=pl.BlockSpec((TB, D_out), lambda i: (i, 0)),
        compiler_params=pltpu.CompilerParams(
            dimension_semantics=("parallel",)),
        cost_estimate=cost,
    )(x_p, w1_p, b1_p, w2_p, b2_p)

    return out_p if B_p == B else out_p[:B]


def init_linear_params(key, in_features, out_features):
    """PyTorch nn.Linear-style init: U(-1/sqrt(fan_in), 1/sqrt(fan_in)).
    Returns weight already transposed to [in_features, out_features]."""
    kw, kb = jax.random.split(key)
    bound = 1.0 / jnp.sqrt(jnp.float32(in_features))
    w = jax.random.uniform(kw, (in_features, out_features), jnp.float32, -bound, bound)
    b = jax.random.uniform(kb, (out_features,), jnp.float32, -bound, bound)
    return w, b


if __name__ == "__main__":
    # Synthetic sizes consistent with the module:
    #   input_dim = len(vocab)  -> 64, hidden_dim = 50, output_dim = num_labels -> 3
    batch = 2
    input_dim = 64
    hidden_dim = 50
    output_dim = 3

    key = jax.random.PRNGKey(0)
    kx, k1, k2 = jax.random.split(key, 3)

    # Bag-of-words style input (counts), float32 like the PyTorch forward.
    x = jax.random.uniform(kx, (batch, input_dim), jnp.float32, 0.0, 3.0)

    w1, b1 = init_linear_params(k1, input_dim, hidden_dim)
    w2, b2 = init_linear_params(k2, hidden_dim, output_dim)

    # One-time parameter prep (padding / bf16 cast hoisted out of the forward).
    params = prepare_params(w1, b1, w2, b2)

    out = simple_classifier_forward(x, *params)
    out = jax.block_until_ready(out)
    assert out.shape == (batch, output_dim)

    # Reference mimicking the kernel's bf16-input / f32-accumulate math.
    xb = x.astype(jnp.bfloat16).astype(jnp.float32)
    w1b = w1.astype(jnp.bfloat16).astype(jnp.float32)
    w2b = w2.astype(jnp.bfloat16).astype(jnp.float32)
    h_ref = jnp.maximum(xb @ w1b + b1[None, :], 0.0)
    ref = h_ref.astype(jnp.bfloat16).astype(jnp.float32) @ w2b + b2[None, :]

    # Full-f32 reference as a sanity bound on bf16 rounding.
    ref_f32 = jnp.maximum(x @ w1 + b1[None, :], 0.0) @ w2 + b2[None, :]

    assert jnp.allclose(out, ref, atol=1e-3, rtol=1e-3)
    assert jnp.allclose(out, ref_f32, atol=3e-2, rtol=3e-2)

    print("KERNEL_OK")
</pallas_src>

<mosaic_0001>
module attributes {stable_mosaic.version = 11 : i64} {
  func.func @mlp_kernel(%arg0: i32, %arg1: memref<8x64xf32, #tpu.memory_space<vmem>>, %arg2: memref<64x128xbf16, #tpu.memory_space<vmem>>, %arg3: memref<1x128xf32, #tpu.memory_space<vmem>>, %arg4: memref<128x3xbf16, #tpu.memory_space<vmem>>, %arg5: memref<1x3xf32, #tpu.memory_space<vmem>>, %arg6: memref<8x3xf32, #tpu.memory_space<vmem>>) attributes {dimension_semantics = [#tpu.dimension_semantics<parallel>], iteration_bounds = array<i64: 1>, scalar_prefetch = 0 : i64, scratch_operands = 0 : i64, tpu.core_type = #tpu.core_type<tc>, window_params = [{transform_indices = @transform_0, window_bounds = array<i64: 8, 64>}, {pipeline_mode = #tpu.pipeline_mode<synchronous>, transform_indices = @transform_1, window_bounds = array<i64: 64, 128>}, {pipeline_mode = #tpu.pipeline_mode<synchronous>, transform_indices = @transform_2, window_bounds = array<i64: 1, 128>}, {pipeline_mode = #tpu.pipeline_mode<synchronous>, transform_indices = @transform_3, window_bounds = array<i64: 128, 3>}, {pipeline_mode = #tpu.pipeline_mode<synchronous>, transform_indices = @transform_4, window_bounds = array<i64: 1, 3>}, {transform_indices = @transform_5, window_bounds = array<i64: 8, 3>}]} {
    %c0 = arith.constant 0 : index
    %c0_0 = arith.constant 0 : index
    %0 = vector.load %arg1[%c0, %c0_0] : memref<8x64xf32, #tpu.memory_space<vmem>>, vector<8x64xf32>
    %1 = arith.truncf %0 : vector<8x64xf32> to vector<8x64xbf16>
    %c0_1 = arith.constant 0 : index
    %c0_2 = arith.constant 0 : index
    %2 = vector.load %arg2[%c0_1, %c0_2] : memref<64x128xbf16, #tpu.memory_space<vmem>>, vector<64x128xbf16>
    %cst = arith.constant dense<0.000000e+00> : vector<8x128xf32>
    %3 = tpu.matmul %1, %2, %cst {dimension_numbers = #tpu.dot_dimension_numbers<[1], [0], [0], [1], [0, 0, 1, 1], [], []>} : vector<8x64xbf16>, vector<64x128xbf16>, vector<8x128xf32> -> vector<8x128xf32>
    %c0_3 = arith.constant 0 : index
    %c0_4 = arith.constant 0 : index
    %4 = vector.load %arg3[%c0_3, %c0_4] : memref<1x128xf32, #tpu.memory_space<vmem>>, vector<1x128xf32>
    %5 = vector.broadcast %4 : vector<1x128xf32> to vector<8x128xf32>
    %6 = arith.addf %3, %5 : vector<8x128xf32>
    %cst_5 = arith.constant 0.000000e+00 : f32
    %7 = vector.broadcast %cst_5 : f32 to vector<8x128xf32>
    %8 = arith.maximumf %6, %7 : vector<8x128xf32>
    %9 = arith.truncf %8 : vector<8x128xf32> to vector<8x128xbf16>
    %c0_6 = arith.constant 0 : index
    %c0_7 = arith.constant 0 : index
    %10 = vector.load %arg4[%c0_6, %c0_7] : memref<128x3xbf16, #tpu.memory_space<vmem>>, vector<128x3xbf16>
    %cst_8 = arith.constant dense<0.000000e+00> : vector<8x3xf32>
    %11 = tpu.matmul %9, %10, %cst_8 {dimension_numbers = #tpu.dot_dimension_numbers<[1], [0], [0], [1], [0, 0, 1, 1], [], []>} : vector<8x128xbf16>, vector<128x3xbf16>, vector<8x3xf32> -> vector<8x3xf32>
    %c0_9 = arith.constant 0 : index
    %c0_10 = arith.constant 0 : index
    %12 = vector.load %arg5[%c0_9, %c0_10] : memref<1x3xf32, #tpu.memory_space<vmem>>, vector<1x3xf32>
    %13 = vector.broadcast %12 : vector<1x3xf32> to vector<8x3xf32>
    %14 = arith.addf %11, %13 : vector<8x3xf32>
    %c0_11 = arith.constant 0 : index
    %c0_12 = arith.constant 0 : index
    %15 = vector.load %arg6[%c0_11, %c0_12] : memref<8x3xf32, #tpu.memory_space<vmem>>, vector<8x3xf32>
    tpu.vector_store %arg6[%c0_11, %c0_12], %14 {strides = array<i32>} : memref<8x3xf32, #tpu.memory_space<vmem>>, vector<8x3xf32>,
    return
  }
  func.func @transform_0(%arg0: i32) -> (i32, i32) {
    %c0_i32 = arith.constant 0 : i32
    %c0_i32_0 = arith.constant 0 : i32
    return %arg0, %c0_i32 : i32, i32
  }
  func.func @transform_1(%arg0: i32) -> (i32, i32) {
    %c0_i32 = arith.constant 0 : i32
    %c0_i32_0 = arith.constant 0 : i32
    %c0_i32_1 = arith.constant 0 : i32
    return %c0_i32, %c0_i32_0 : i32, i32
  }
  func.func @transform_2(%arg0: i32) -> (i32, i32) {
    %c0_i32 = arith.constant 0 : i32
    %c0_i32_0 = arith.constant 0 : i32
    %c0_i32_1 = arith.constant 0 : i32
    return %c0_i32, %c0_i32_0 : i32, i32
  }
  func.func @transform_3(%arg0: i32) -> (i32, i32) {
    %c0_i32 = arith.constant 0 : i32
    %c0_i32_0 = arith.constant 0 : i32
    %c0_i32_1 = arith.constant 0 : i32
    return %c0_i32, %c0_i32_0 : i32, i32
  }
  func.func @transform_4(%arg0: i32) -> (i32, i32) {
    %c0_i32 = arith.constant 0 : i32
    %c0_i32_0 = arith.constant 0 : i32
    %c0_i32_1 = arith.constant 0 : i32
    return %c0_i32, %c0_i32_0 : i32, i32
  }
  func.func @transform_5(%arg0: i32) -> (i32, i32) {
    %c0_i32 = arith.constant 0 : i32
    %c0_i32_0 = arith.constant 0 : i32
    return %arg0, %c0_i32 : i32, i32
  }
}

</mosaic_0001>

<bundles_post_ra>
// kernel: tpu_custom_call.1
= control target key start
LH: loop header
LB: loop body
LE: loop exit
PB: predicated region body
PF: predicated region fallthrough
CT: control target
= control target key end

     0   :  { %vm59_vm0 = vcmask 523264   ;;  %vm159_vm1 = vcmask 23552   ;;  %s306_s1 = inlined_call_operand.vmem [shape: bf16[64,128], index: 1, kind: input, shape index: {}]   ;;  %s307_s3 = inlined_call_operand.vmem [shape: bf16[128,3], index: 3, kind: input, shape index: {}]   ;;  %s308_s2 = inlined_call_operand.vmem [shape: f32[1,128], index: 2, kind: input, shape index: {}]   ;;  %s309_s0 = inlined_call_operand.vmem [shape: f32[8,64], index: 0, kind: input, shape index: {}]   ;;  %s310_s4 = inlined_call_operand.vmem [shape: f32[1,3], index: 4, kind: input, shape index: {}]   ;;  %s311_s5 = inlined_call_operand.vmem [shape: f32[8,3], index: 5, kind: output, shape index: {}]  }
   0x1   :  { %v217_v0 = vld [vmem:[%s306_s1 + $0x18] sm:$0xff]  ;;  %v216_v2 = vld [vmem:[%s306_s1 + $0x10] sm:$0xff]  ;;  %v215_v4 = vld [vmem:[%s306_s1 + $0x8] sm:$0xff] }
   0x2   :  { %v225_v1 = vld [vmem:[%s307_s3 + $0x38] sm:$0xff]  ;;  %67 = vmatpush.bf16.msra.mxu0 %v217_v0  ;;  %v224_v3 = vld [vmem:[%s307_s3 + $0x30] sm:$0xff]  ;;  %v223_v5 = vld [vmem:[%s307_s3 + $0x28] sm:$0xff] }
   0x3   :  { %146 = vmatpush.bf16.msra.mxu1 %v225_v1  ;;  %v214_v6 = vld [vmem:[%s306_s1] sm:$0xff]  ;;  %v221_v10 = vld [vmem:[%s307_s3 + $0x18] sm:$0xff]  ;;  %v220_v11 = vld [vmem:[%s307_s3 + $0x10] sm:$0xff] }
   0x4   :  { %v21_v7 = vld [vmem:[%s309_s0] sm:$0xff]  ;;  %v219_v12 = vld [vmem:[%s307_s3 + $0x8] sm:$0xff] }
   0x5   :  { %v222_v8 = vld [vmem:[%s307_s3 + $0x20] sm:$0xff]  ;;  %v22_v9 = vpack.c.bf16 %v21_v7, %v21_v7 }
   0x6   :  { %68 = vmatpush.bf16.msra.mxu0 %v216_v2  ;;  %v218_v13 = vld [vmem:[%s307_s3] sm:$0xff] }
   0x7   :  { %147 = vmatpush.bf16.msra.mxu1 %v224_v3  ;;  %v226_v14 = vld [vmem:[%s308_s2] ss:$0 sm:$0xff] }
   0x8   :  { %v227_v20 = vld [vmem:[%s310_s4] ss:$0 sm:$0xff] }
   0xa   :  { %69 = vmatpush.bf16.msra.mxu0 %v215_v4 }
   0xb   :  { %148 = vmatpush.bf16.msra.mxu1 %v223_v5 }
   0xe   :  { %70 = vmatpush.bf16.msra.mxu0 %v214_v6 }
   0xf   :  { %149 = vmatpush.bf16.msra.mxu1 %v222_v8 }
  0x11   :  { %181 = vmatmul.msk.bf16.vlgmr.msra.gmra.mxu0 %vm59_vm0, %v22_v9 }
  0x13   :  { %150 = vmatpush.bf16.msra.mxu1 %v221_v10 }
  0x17   :  { %151 = vmatpush.bf16.msra.mxu1 %v220_v11 }
  0x1b   :  { %152 = vmatpush.bf16.msra.mxu1 %v219_v12 }
  0x1f   :  { %153 = vmatpush.bf16.msra.mxu1 %v218_v13 }
  0x8e   :  { %v72_v15 = vpop.f32.mrf.mxu0 }
  0x8f   :  { %v73_v16 = vadd.f32 %v226_v14, %v72_v15 }
  0x91   :  { %v76_v17 = vmax.f32 %v73_v16, 0.0 }
  0x93   :  { %v77_v18 = vpack.c.bf16 %v76_v17, %v76_v17 }
  0x95   :  { %154 = vmatmul.bf16.vlgmr.msra.gmra.mxu1 %v77_v18 }
  0x96   :  { %v74_v19 = vpop.f32.mrf.mxu0 }
 0x112   :  { %v155_v21 = vpop.f32.mrf.mxu1 }
 0x113   :  { %v156_v22 = vadd.f32 %v227_v20, %v155_v21 }
 0x115   :  { %160 = vst.msk [vmem:[%s311_s5] sm:$0xff] %vm159_vm1, %v156_v22 }
 0x11a   :  { %v157_v23 = vpop.f32.mrf.mxu1 }

</bundles_post_ra>
